<compile_context>
chip_gen: v5e
topology: v5e:2x2
jax: 0.10.0
libtpu: 0.0.40
codegen_flags: <defaults>
</compile_context>

<pallas_src>
import functools

import jax
import jax.numpy as jnp
from jax.experimental import pallas as pl
from jax.experimental.pallas import tpu as pltpu


# --------------------------- VMEM / block budgeting -------------------------


def _sublanes(dtype):
    # dtype-aware sublane rounding: f32 -> 8, bf16 -> 16, int8/fp8 -> 32
    return max(8, 32 // jnp.dtype(dtype).itemsize)


def _phys_vmem_bytes():
    try:
        return int(pltpu.get_tpu_info().vmem_capacity_bytes)
    except Exception:
        return 64 << 20  # conservative default: v7x physical VMEM per TC


def _block_budget():
    """(target_block_bytes, max_block_bytes, phys_vmem_bytes)."""
    phys = _phys_vmem_bytes()
    limit_cap = min(phys // 2, 64 << 20)
    max_block = limit_cap // 6          # 2x in + 2x out double-buffered + margin
    target = min(8 << 20, max_block)    # >=1 MiB blocks already saturate HBM BW
    return target, max_block, phys


def _vmem_limit(block_bytes, phys):
    """Scoped-VMEM limit for a pallas_call with double-buffered in+out blocks."""
    want = 4 * block_bytes + (8 << 20)
    return int(min(max(32 << 20, want), phys - (8 << 20)))


def _pick_rows(rows, row_bytes, sublane, target_bytes, want_two_steps):
    """Rows per block along a tiled axis: a multiple of `sublane` (or == rows),
    sized to ~target_bytes, optionally leaving >= 2 grid steps (megacore)."""
    if rows <= sublane:
        return rows
    cap = max(1, target_bytes // max(row_bytes, 1))
    if want_two_steps:
        cap = min(cap, max(1, rows // 2))
    br = (min(cap, rows) // sublane) * sublane
    return max(sublane, br)


# --------------------------------- kernels ----------------------------------


def _bn_kernel(x_ref, g_ref, b_ref, o_ref, *, eps):
    """One-pass BatchNorm: x block (N, cb, HW); stats over (N, HW) per channel."""
    x = x_ref[...].astype(jnp.float32)
    cnt = x.shape[0] * x.shape[2]
    s = jnp.sum(jnp.sum(x, axis=2, keepdims=True), axis=0, keepdims=True)
    ss = jnp.sum(jnp.sum(x * x, axis=2, keepdims=True), axis=0, keepdims=True)
    mean = s / cnt                                   # (1, cb, 1)
    var = jnp.maximum(ss / cnt - mean * mean, 0.0)   # clamp: cancellation / padding
    g = g_ref[...].astype(jnp.float32)[None, :, :]   # (1, cb, 1)
    b = b_ref[...].astype(jnp.float32)[None, :, :]
    scale = jax.lax.rsqrt(var + eps) * g
    shift = b - mean * scale
    xa = x_ref[...].astype(jnp.float32)              # second read bounds live ranges
    o_ref[...] = (xa * scale + shift).astype(o_ref.dtype)


def _bn_stats_kernel(x_ref, sum_ref, sq_ref, *, hw_total, hwb):
    """Two-pass BN, pass 1: accumulate per-channel sum / sumsq over (N, HW)."""
    j = pl.program_id(1)

    @pl.when(j == 0)
    def _():
        sum_ref[...] = jnp.zeros_like(sum_ref)
        sq_ref[...] = jnp.zeros_like(sq_ref)

    x = x_ref[...].astype(jnp.float32)               # (N, cb, hwb)
    # Mask lanes past the true HW extent (partial last HW block would otherwise
    # contaminate the reduction with padded garbage).
    col = jax.lax.broadcasted_iota(jnp.int32, x.shape, 2) + j * hwb
    x = jnp.where(col < hw_total, x, 0.0)
    sum_ref[...] += jnp.sum(jnp.sum(x, axis=2, keepdims=True), axis=0)
    sq_ref[...] += jnp.sum(jnp.sum(x * x, axis=2, keepdims=True), axis=0)


def _bn_apply_kernel(x_ref, scale_ref, shift_ref, o_ref):
    """Two-pass BN, pass 2: fused y = x * scale + shift (elementwise)."""
    x = x_ref[...].astype(jnp.float32)
    scale = scale_ref[...].astype(jnp.float32)[None, :, :]
    shift = shift_ref[...].astype(jnp.float32)[None, :, :]
    o_ref[...] = (x * scale + shift).astype(o_ref.dtype)


def _in_kernel(x_ref, o_ref, *, eps):
    """InstanceNorm (affine=False): x block (nb, cb, HW); stats per (n, c)."""
    x = x_ref[...].astype(jnp.float32)
    cnt = x.shape[-1]
    mean = jnp.sum(x, axis=-1, keepdims=True) / cnt
    var = jnp.maximum(jnp.sum(x * x, axis=-1, keepdims=True) / cnt - mean * mean, 0.0)
    scale = jax.lax.rsqrt(var + eps)
    shift = -mean * scale
    xa = x_ref[...].astype(jnp.float32)
    o_ref[...] = (xa * scale + shift).astype(o_ref.dtype)


def _gn_kernel(x_ref, g_ref, b_ref, o_ref, *, eps, hw, cg):
    """GroupNorm on lane-dense flat layout: x block (br, Cg*HW); stats per row."""
    x = x_ref[...].astype(jnp.float32)               # (br, L) with L = cg*hw
    L = x.shape[-1]
    mean = jnp.sum(x, axis=-1, keepdims=True) / L
    var = jnp.maximum(jnp.sum(x * x, axis=-1, keepdims=True) / L - mean * mean, 0.0)
    inv = jax.lax.rsqrt(var + eps)                   # (br, 1)
    g = g_ref[...].astype(jnp.float32)               # (br, cg) tiny side input
    b = b_ref[...].astype(jnp.float32)
    # Expand the per-channel affine to the flat lane layout without any
    # in-kernel reshape: lane l belongs to channel l // hw.  cg = C/32 is small,
    # and this is pure VPU filler under the HBM-bandwidth roofline.
    ch = jax.lax.broadcasted_iota(jnp.int32, x.shape, 1) // hw
    g_rep = jnp.zeros_like(x)
    b_rep = jnp.zeros_like(x)
    for c in range(cg):
        m = ch == c
        g_rep = jnp.where(m, g[:, c][:, None], g_rep)
        b_rep = jnp.where(m, b[:, c][:, None], b_rep)
    scale = inv * g_rep
    shift = b_rep - mean * scale
    xa = x_ref[...].astype(jnp.float32)
    o_ref[...] = (xa * scale + shift).astype(o_ref.dtype)


# --------------------------------- wrappers ----------------------------------


def _batchnorm(x, gamma, beta, eps, *, force_two_pass=False):
    N, C, H, W = x.shape
    HW = H * W
    itemsize = x.dtype.itemsize
    x3 = x.reshape(N, C, HW)                         # free reshape, no transpose
    sub = _sublanes(x.dtype)
    target, max_block, phys = _block_budget()

    per_ch_bytes = N * HW * itemsize                 # one channel's full (N, HW) slab
    cb_min = C if C <= sub else sub
    one_pass_ok = (not force_two_pass) and (cb_min * per_ch_bytes <= max_block)

    g2 = gamma.reshape(C, 1).astype(jnp.float32)
    b2 = beta.reshape(C, 1).astype(jnp.float32)

    if one_pass_ok:
        cb = _pick_rows(C, per_ch_bytes, sub, target, want_two_steps=False)
        block_bytes = N * cb * HW * itemsize
        y3 = pl.pallas_call(
            functools.partial(_bn_kernel, eps=eps),
            out_shape=jax.ShapeDtypeStruct((N, C, HW), x.dtype),
            grid_spec=pltpu.PrefetchScalarGridSpec(
                num_scalar_prefetch=0,
                grid=(pl.cdiv(C, cb),),
                in_specs=[
                    pl.BlockSpec((N, cb, HW), lambda i: (0, i, 0)),
                    pl.BlockSpec((cb, 1), lambda i: (i, 0)),
                    pl.BlockSpec((cb, 1), lambda i: (i, 0)),
                ],
                out_specs=pl.BlockSpec((N, cb, HW), lambda i: (0, i, 0)),
            ),
            compiler_params=pltpu.CompilerParams(
                dimension_semantics=("parallel",),
                vmem_limit_bytes=_vmem_limit(block_bytes, phys)),
        )(x3, g2, b2)
        return y3.reshape(N, C, H, W)

    # ---- two-pass fallback: HW-split stats + fused elementwise apply ----
    cb = C if C <= sub else sub
    if HW <= 128:
        hwb = HW
    else:
        hwb = max(128, (target // max(N * cb * itemsize, 1)) // 128 * 128)
        hwb = min(hwb, max(128, (HW // 128) * 128))
        hwb = min(hwb, max(128, (HW // 2) // 128 * 128))   # >= 2 steps over HW
    grid = (pl.cdiv(C, cb), pl.cdiv(HW, hwb))
    block_bytes = N * cb * hwb * itemsize

    sums, sqs = pl.pallas_call(
        functools.partial(_bn_stats_kernel, hw_total=HW, hwb=hwb),
        out_shape=(jax.ShapeDtypeStruct((C, 1), jnp.float32),
                   jax.ShapeDtypeStruct((C, 1), jnp.float32)),
        grid_spec=pltpu.PrefetchScalarGridSpec(
            num_scalar_prefetch=0,
            grid=grid,
            in_specs=[pl.BlockSpec((N, cb, hwb), lambda i, j: (0, i, j))],
            out_specs=(pl.BlockSpec((cb, 1), lambda i, j: (i, 0)),
                       pl.BlockSpec((cb, 1), lambda i, j: (i, 0))),
        ),
        compiler_params=pltpu.CompilerParams(
            dimension_semantics=("parallel", "arbitrary"),
            vmem_limit_bytes=_vmem_limit(block_bytes, phys)),
    )(x3)

    cnt = float(N * HW)
    mean = sums / cnt
    var = jnp.maximum(sqs / cnt - mean * mean, 0.0)
    scale = g2 * jax.lax.rsqrt(var + eps)            # tiny (C,1) XLA ops
    shift = b2 - mean * scale

    y3 = pl.pallas_call(
        _bn_apply_kernel,
        out_shape=jax.ShapeDtypeStruct((N, C, HW), x.dtype),
        grid_spec=pltpu.PrefetchScalarGridSpec(
            num_scalar_prefetch=0,
            grid=grid,
            in_specs=[
                pl.BlockSpec((N, cb, hwb), lambda i, j: (0, i, j)),
                pl.BlockSpec((cb, 1), lambda i, j: (i, 0)),
                pl.BlockSpec((cb, 1), lambda i, j: (i, 0)),
            ],
            out_specs=pl.BlockSpec((N, cb, hwb), lambda i, j: (0, i, j)),
        ),
        compiler_params=pltpu.CompilerParams(
            dimension_semantics=("parallel", "parallel"),
            vmem_limit_bytes=_vmem_limit(block_bytes, phys)),
    )(x3, scale, shift)
    return y3.reshape(N, C, H, W)


def _instancenorm(x, eps):
    N, C, H, W = x.shape
    HW = H * W
    itemsize = x.dtype.itemsize
    x3 = x.reshape(N, C, HW)
    sub = _sublanes(x.dtype)
    target, max_block, phys = _block_budget()
    row_bytes = HW * itemsize
    # TODO(synk): if a single (sublane, HW) slab exceeds the VMEM budget
    # (very large H*W), an HW-split two-pass variant like BN's is needed.
    cb = _pick_rows(C, row_bytes, sub, target, want_two_steps=(N < 2))
    nb = 1
    if cb >= C:
        cb = C
        sample_bytes = C * row_bytes
        nb = max(1, min(N, target // max(sample_bytes, 1)))
        if N >= 2:
            nb = min(nb, N // 2)      # keep >= 2 parallel grid steps (v7x: 2 TCs)
    block_bytes = nb * cb * HW * itemsize
    grid = (pl.cdiv(N, nb), pl.cdiv(C, cb))
    y3 = pl.pallas_call(
        functools.partial(_in_kernel, eps=eps),
        out_shape=jax.ShapeDtypeStruct((N, C, HW), x.dtype),
        grid_spec=pltpu.PrefetchScalarGridSpec(
            num_scalar_prefetch=0,
            grid=grid,
            in_specs=[pl.BlockSpec((nb, cb, HW), lambda n, i: (n, i, 0))],
            out_specs=pl.BlockSpec((nb, cb, HW), lambda n, i: (n, i, 0)),
        ),
        compiler_params=pltpu.CompilerParams(
            dimension_semantics=("parallel", "parallel"),
            vmem_limit_bytes=_vmem_limit(block_bytes, phys)),
    )(x3)
    return y3.reshape(N, C, H, W)


def _groupnorm(x, gamma, beta, groups, eps):
    N, C, H, W = x.shape
    G = groups
    Cg = C // G
    HW = H * W
    itemsize = x.dtype.itemsize
    rows = N * G
    L = Cg * HW                                       # lane-dense when L % 128 == 0
    x2 = x.reshape(rows, L)
    g2 = jnp.tile(gamma.reshape(G, Cg).astype(jnp.float32), (N, 1))   # (rows, Cg)
    b2 = jnp.tile(beta.reshape(G, Cg).astype(jnp.float32), (N, 1))
    sub = _sublanes(x.dtype)
    target, max_block, phys = _block_budget()
    # TODO(synk): if a single group's (sublane, Cg*HW) slab exceeds the VMEM
    # budget, a two-pass split over HW would be required.
    br = _pick_rows(rows, L * itemsize, sub, target, want_two_steps=True)
    block_bytes = br * L * itemsize
    grid = (pl.cdiv(rows, br),)
    y2 = pl.pallas_call(
        functools.partial(_gn_kernel, eps=eps, hw=HW, cg=Cg),
        out_shape=jax.ShapeDtypeStruct((rows, L), x.dtype),
        grid_spec=pltpu.PrefetchScalarGridSpec(
            num_scalar_prefetch=0,
            grid=grid,
            in_specs=[
                pl.BlockSpec((br, L), lambda i: (i, 0)),
                pl.BlockSpec((br, Cg), lambda i: (i, 0)),
                pl.BlockSpec((br, Cg), lambda i: (i, 0)),
            ],
            out_specs=pl.BlockSpec((br, L), lambda i: (i, 0)),
        ),
        compiler_params=pltpu.CompilerParams(
            dimension_semantics=("parallel",),
            vmem_limit_bytes=_vmem_limit(block_bytes, phys)),
    )(x2, g2, b2)
    return y2.reshape(N, C, H, W)


# -------------------------------- NormLayer ----------------------------------


class NormLayer:
    """JAX/Pallas port of basicsr NormLayer (forward only; BN uses batch stats)."""

    def __init__(self, channels, norm_type="bn", key=None):
        norm_type = norm_type.lower()
        self.norm_type = norm_type
        self.channels = channels
        if key is None:
            key = jax.random.PRNGKey(0)
        kg, kb = jax.random.split(key)

        if norm_type == "bn":
            self.gamma = jax.random.uniform(kg, (channels,), jnp.float32, 0.5, 1.5)
            self.beta = jax.random.uniform(kb, (channels,), jnp.float32, -0.5, 0.5)
            self.eps = 1e-5
        elif norm_type == "in":
            self.eps = 1e-5                        # InstanceNorm2d(affine=False)
        elif norm_type == "gn":
            assert channels % 32 == 0, "GroupNorm here uses 32 groups."
            self.num_groups = 32
            self.gamma = jax.random.uniform(kg, (channels,), jnp.float32, 0.5, 1.5)
            self.beta = jax.random.uniform(kb, (channels,), jnp.float32, -0.5, 0.5)
            self.eps = 1e-6                        # matches nn.GroupNorm(eps=1e-06)
        elif norm_type == "none":
            pass
        else:
            raise ValueError(f"Norm type {norm_type} not support.")

    def __call__(self, x):
        N, C, H, W = x.shape
        assert C == self.channels
        if self.norm_type == "none":
            return x                               # x * 1.0 is the identity for floats
        if self.norm_type == "bn":
            return _batchnorm(x, self.gamma, self.beta, self.eps)
        if self.norm_type == "in":
            return _instancenorm(x, self.eps)
        if self.norm_type == "gn":
            return _groupnorm(x, self.gamma, self.beta, self.num_groups, self.eps)
        raise ValueError(self.norm_type)


# -------------------------------- references ---------------------------------


def _ref_bn(x, gamma, beta, eps):
    mean = jnp.mean(x, axis=(0, 2, 3), keepdims=True)
    var = jnp.mean((x - mean) ** 2, axis=(0, 2, 3), keepdims=True)
    y = (x - mean) / jnp.sqrt(var + eps)
    return y * gamma[None, :, None, None] + beta[None, :, None, None]


def _ref_in(x, eps):
    mean = jnp.mean(x, axis=(2, 3), keepdims=True)
    var = jnp.mean((x - mean) ** 2, axis=(2, 3), keepdims=True)
    return (x - mean) / jnp.sqrt(var + eps)


def _ref_gn(x, gamma, beta, groups, eps):
    N, C, H, W = x.shape
    xg = x.reshape(N, groups, C // groups, H, W)
    mean = jnp.mean(xg, axis=(2, 3, 4), keepdims=True)
    var = jnp.mean((xg - mean) ** 2, axis=(2, 3, 4), keepdims=True)
    y = ((xg - mean) / jnp.sqrt(var + eps)).reshape(N, C, H, W)
    return y * gamma[None, :, None, None] + beta[None, :, None, None]


# ----------------------------------- main ------------------------------------


if __name__ == "__main__":
    key = jax.random.PRNGKey(0)
    k_x1, k_x2, k_p = jax.random.split(key, 3)

    # BN / IN / none at channels=4
    x = jax.random.normal(k_x1, (2, 4, 16, 16), jnp.float32)

    bn = NormLayer(4, "bn", key=k_p)
    y_bn = jax.block_until_ready(bn(x))
    ref_bn = _ref_bn(x, bn.gamma, bn.beta, bn.eps)
    assert jnp.allclose(y_bn, ref_bn, atol=1e-4), "bn mismatch"

    # also exercise the two-pass (HW-split) BN fallback path
    y_bn2 = jax.block_until_ready(
        _batchnorm(x, bn.gamma, bn.beta, bn.eps, force_two_pass=True))
    assert jnp.allclose(y_bn2, ref_bn, atol=1e-4), "bn two-pass mismatch"

    inorm = NormLayer(4, "in", key=k_p)
    y_in = jax.block_until_ready(inorm(x))
    assert jnp.allclose(y_in, _ref_in(x, inorm.eps), atol=1e-4), "in mismatch"

    ident = NormLayer(4, "none", key=k_p)
    y_id = jax.block_until_ready(ident(x))
    assert jnp.allclose(y_id, x), "none mismatch"

    # GN needs channels divisible by 32
    xg = jax.random.normal(k_x2, (2, 64, 8, 8), jnp.float32)
    gn = NormLayer(64, "gn", key=k_p)
    y_gn = jax.block_until_ready(gn(xg))
    assert jnp.allclose(y_gn, _ref_gn(xg, gn.gamma, gn.beta, 32, gn.eps), atol=1e-4), "gn mismatch"

    print("KERNEL_OK")
</pallas_src>

<mosaic_0001>
module attributes {stable_mosaic.version = 11 : i64} {
  func.func @_bn_kernel(%arg0: i32, %arg1: memref<2x4x256xf32, #tpu.memory_space<vmem>>, %arg2: memref<4x1xf32, #tpu.memory_space<vmem>>, %arg3: memref<4x1xf32, #tpu.memory_space<vmem>>, %arg4: memref<2x4x256xf32, #tpu.memory_space<vmem>>) attributes {dimension_semantics = [#tpu.dimension_semantics<parallel>], iteration_bounds = array<i64: 1>, scalar_prefetch = 0 : i64, scratch_operands = 0 : i64, tpu.core_type = #tpu.core_type<tc>, window_params = [{transform_indices = @transform_0, window_bounds = array<i64: 2, 4, 256>}, {transform_indices = @transform_1, window_bounds = array<i64: 4, 1>}, {transform_indices = @transform_2, window_bounds = array<i64: 4, 1>}, {transform_indices = @transform_3, window_bounds = array<i64: 2, 4, 256>}]} {
    %c0 = arith.constant 0 : index
    %c0_0 = arith.constant 0 : index
    %c0_1 = arith.constant 0 : index
    %0 = vector.load %arg1[%c0, %c0_0, %c0_1] : memref<2x4x256xf32, #tpu.memory_space<vmem>>, vector<2x4x256xf32>
    %cst = arith.constant dense<0.000000e+00> : vector<2x4xf32>
    %1 = vector.multi_reduction <add>, %0, %cst [2] : vector<2x4x256xf32> to vector<2x4xf32>
    %2 = vector.shape_cast %1 : vector<2x4xf32> to vector<2x4x1xf32>
    %cst_2 = arith.constant dense<0.000000e+00> : vector<4x1xf32>
    %3 = vector.multi_reduction <add>, %2, %cst_2 [0] : vector<2x4x1xf32> to vector<4x1xf32>
    %4 = vector.shape_cast %3 : vector<4x1xf32> to vector<1x4x1xf32>
    %5 = arith.mulf %0, %0 : vector<2x4x256xf32>
    %cst_3 = arith.constant dense<0.000000e+00> : vector<2x4xf32>
    %6 = vector.multi_reduction <add>, %5, %cst_3 [2] : vector<2x4x256xf32> to vector<2x4xf32>
    %7 = vector.shape_cast %6 : vector<2x4xf32> to vector<2x4x1xf32>
    %cst_4 = arith.constant dense<0.000000e+00> : vector<4x1xf32>
    %8 = vector.multi_reduction <add>, %7, %cst_4 [0] : vector<2x4x1xf32> to vector<4x1xf32>
    %9 = vector.shape_cast %8 : vector<4x1xf32> to vector<1x4x1xf32>
    %cst_5 = arith.constant 5.120000e+02 : f32
    %10 = vector.broadcast %cst_5 : f32 to vector<1x4x1xf32>
    %11 = arith.divf %4, %10 : vector<1x4x1xf32>
    %cst_6 = arith.constant 5.120000e+02 : f32
    %12 = vector.broadcast %cst_6 : f32 to vector<1x4x1xf32>
    %13 = arith.divf %9, %12 : vector<1x4x1xf32>
    %14 = arith.mulf %11, %11 : vector<1x4x1xf32>
    %15 = arith.subf %13, %14 : vector<1x4x1xf32>
    %cst_7 = arith.constant 0.000000e+00 : f32
    %16 = vector.broadcast %cst_7 : f32 to vector<1x4x1xf32>
    %17 = arith.maximumf %15, %16 : vector<1x4x1xf32>
    %c0_8 = arith.constant 0 : index
    %c0_9 = arith.constant 0 : index
    %18 = vector.load %arg2[%c0_8, %c0_9] : memref<4x1xf32, #tpu.memory_space<vmem>>, vector<4x1xf32>
    %19 = vector.shape_cast %18 : vector<4x1xf32> to vector<1x4x1xf32>
    %c0_10 = arith.constant 0 : index
    %c0_11 = arith.constant 0 : index
    %20 = vector.load %arg3[%c0_10, %c0_11] : memref<4x1xf32, #tpu.memory_space<vmem>>, vector<4x1xf32>
    %21 = vector.shape_cast %20 : vector<4x1xf32> to vector<1x4x1xf32>
    %cst_12 = arith.constant 9.99999974E-6 : f32
    %22 = vector.broadcast %cst_12 : f32 to vector<1x4x1xf32>
    %23 = arith.addf %17, %22 : vector<1x4x1xf32>
    %24 = math.rsqrt %23 : vector<1x4x1xf32>
    %25 = arith.mulf %24, %19 : vector<1x4x1xf32>
    %26 = arith.mulf %11, %25 : vector<1x4x1xf32>
    %27 = arith.subf %21, %26 : vector<1x4x1xf32>
    %c0_13 = arith.constant 0 : index
    %c0_14 = arith.constant 0 : index
    %c0_15 = arith.constant 0 : index
    %28 = vector.load %arg1[%c0_13, %c0_14, %c0_15] : memref<2x4x256xf32, #tpu.memory_space<vmem>>, vector<2x4x256xf32>
    %29 = vector.broadcast %25 : vector<1x4x1xf32> to vector<2x4x256xf32>
    %30 = arith.mulf %28, %29 : vector<2x4x256xf32>
    %31 = vector.broadcast %27 : vector<1x4x1xf32> to vector<2x4x256xf32>
    %32 = arith.addf %30, %31 : vector<2x4x256xf32>
    %c0_16 = arith.constant 0 : index
    %c0_17 = arith.constant 0 : index
    %c0_18 = arith.constant 0 : index
    %33 = vector.load %arg4[%c0_16, %c0_17, %c0_18] : memref<2x4x256xf32, #tpu.memory_space<vmem>>, vector<2x4x256xf32>
    tpu.vector_store %arg4[%c0_16, %c0_17, %c0_18], %32 {strides = array<i32>} : memref<2x4x256xf32, #tpu.memory_space<vmem>>, vector<2x4x256xf32>,
    return
  }
  func.func @transform_0(%arg0: i32) -> (i32, i32, i32) {
    %c0_i32 = arith.constant 0 : i32
    %c0_i32_0 = arith.constant 0 : i32
    %c0_i32_1 = arith.constant 0 : i32
    return %c0_i32, %arg0, %c0_i32_0 : i32, i32, i32
  }
  func.func @transform_1(%arg0: i32) -> (i32, i32) {
    %c0_i32 = arith.constant 0 : i32
    %c0_i32_0 = arith.constant 0 : i32
    return %arg0, %c0_i32 : i32, i32
  }
  func.func @transform_2(%arg0: i32) -> (i32, i32) {
    %c0_i32 = arith.constant 0 : i32
    %c0_i32_0 = arith.constant 0 : i32
    return %arg0, %c0_i32 : i32, i32
  }
  func.func @transform_3(%arg0: i32) -> (i32, i32, i32) {
    %c0_i32 = arith.constant 0 : i32
    %c0_i32_0 = arith.constant 0 : i32
    %c0_i32_1 = arith.constant 0 : i32
    return %c0_i32, %arg0, %c0_i32_0 : i32, i32, i32
  }
}

</mosaic_0001>

<bundles_post_ra>
// kernel: tpu_custom_call.1
= control target key start
LH: loop header
LB: loop body
LE: loop exit
PB: predicated region body
PF: predicated region fallthrough
CT: control target
= control target key end

     0   :  { %8 = vsyncpa [#allocation3], 0  ;;  %s293_s0 = inlined_call_operand.hbm [shape: f32[2,4,256], index: 0, kind: input, shape index: {}]   ;;  %s294_s1 = inlined_call_operand.vmem [shape: f32[4,1], index: 1, kind: input, shape index: {}]   ;;  %s295_s2 = inlined_call_operand.vmem [shape: f32[4,1], index: 2, kind: input, shape index: {}]   ;;  %s296_s3 = inlined_call_operand.hbm [shape: f32[2,4,256], index: 3, kind: output, shape index: {}]  }
   0x1   :  { %9 = vsyncpa [#allocation4], 0  ;;  %s14_s14 = sshll.u32 %s293_s0, 4  ;;  %s224_s15 = smov [#allocation2]   ;;  %s15_s14 = int_to_ptr.hbm [resolvable:$true] %s14_s14 }
   0x2   :  { %s16_s16 = sshll.u32 %s224_s15, 4  ;;  %s225_s17 = smov 128   ;;  %s17_s16 = int_to_ptr.vmem [resolvable:$true] %s16_s16 }
   0x3   :  { %s226_s18 = smov 8  }
   0x4   :  { %22 = dma.hbm_to_vmem [thread:$0]  %s15_s14, 256, %s17_s16, [#allocation3], %s225_s17, %s225_s17, %s226_s18  }
   0x5   :  { %220 = dma.done.wait [#allocation3], 256  }
   0x6   :  { %221 = vsyncadd [#allocation3], 4294967040  ;;  %v257_v0 = vld [vmem:[#allocation2] sm:$0xff]  ;;  %v259_v1 = vld [vmem:[#allocation2 + $0x8] sm:$0xff]  ;;  %vm46_vm0 = vcmask 1043456   ;;  %v227_v24 = vmov 512.0  }
   0x7   :  { %35 = vst [vmem:[#allocation1] ss:$2 sm:$0xff] %v257_v0  ;;  %v60_v2 = vmul.f32 %v257_v0, %v257_v0  ;;  %v61_v3 = vmul.f32 %v259_v1, %v259_v1  ;;  %168 = vrcp.f32 %v227_v24  ;;  %v228_v29 = vmov 0   ;;  %v100_v53 = vld [vmem:[%s294_s1] sm:$0xf]  ;;  %s230_s1 = smov [#allocation5]  }
   0x8   :  { %39 = vst [vmem:[#allocation1 + $0x10] ss:$2 sm:$0xff] %v259_v1  ;;  %166 = vset.pattern.permute.xlu2 %v228_v29  ;;  %167 = vset.pattern.permute.xlu0 %v228_v29  ;;  %v101_v58 = vld [vmem:[%s295_s2] sm:$0xf]  ;;  %v229_v60 = vmov 839922192  }
   0x9   :  { %v121_v61 = vunpack.c.l.s4 %v229_v60  ;;  %s144_s22 = sshll.u32 %s230_s1, 4  ;;  %s146_s25 = sshll.u32 %s296_s3, 4  ;;  %s145_s22 = int_to_ptr.vmem [resolvable:$true] %s144_s22  ;;  %s147_s25 = int_to_ptr.hbm [resolvable:$true] %s146_s25 }
   0xb   :  { %v122_v63 = vunpack.c.0.s8 %v121_v61 }
   0xd   :  { %v169_v25 = vpop.eup %168 }
   0xe   :  { %v36_v4 = vld.sshfl [vmem:[#allocation1] sm:$0xff pattern:$0x75316420]  ;;  %v37_v5 = vld.sshfl [vmem:[#allocation1 + $0x8] sm:$0xff pattern:$0x75316420]  ;;  %vm93_vm1 = vweird.f32 %v169_v25 }
   0xf   :  { %v47_v6 = vsel %vm46_vm0, %v36_v4, 0.0  ;;  %v48_v7 = vsel %vm46_vm0, %v37_v5, 0.0  ;;  %64 = vst [vmem:[#allocation1] ss:$2 sm:$0xff] %v60_v2  ;;  %v89_v26 = vmul.f32 512.0, %v169_v25 }
  0x10   :  { %v49_v8 = vadd.f32 %v48_v7, %v47_v6  ;;  %v40_v9 = vld.sshfl [vmem:[#allocation1 + $0x10] sm:$0xff pattern:$0x75316420]  ;;  %v41_v10 = vld.sshfl [vmem:[#allocation1 + $0x18] sm:$0xff pattern:$0x75316420] }
  0x11   :  { %68 = vst [vmem:[#allocation1 + $0x10] ss:$2 sm:$0xff] %v61_v3  ;;  %v52_v11 = vsel %vm46_vm0, %v40_v9, 0.0  ;;  %v53_v12 = vsel %vm46_vm0, %v41_v10, 0.0  ;;  %v90_v28 = vsub.f32 1.0, %v89_v26 }
  0x12   :  { %50 = vadd.xlane.f32.xlu0 %v49_v8  ;;  %v54_v15 = vadd.f32 %v53_v12, %v52_v11 }
  0x13   :  { %v91_v30 = vmul.f32 %v169_v25, %v90_v28 }
  0x15   :  { %v92_v33 = vadd.f32 %v169_v25, %v91_v30 }
  0x16   :  { %v65_v13 = vld.sshfl [vmem:[#allocation1] sm:$0xff pattern:$0x75316420]  ;;  %v66_v14 = vld.sshfl [vmem:[#allocation1 + $0x8] sm:$0xff pattern:$0x75316420] }
  0x17   :  { %v75_v16 = vsel %vm46_vm0, %v65_v13, 0.0  ;;  %v76_v17 = vsel %vm46_vm0, %v66_v14, 0.0  ;;  %v94_v37 = vsel %vm93_vm1, %v169_v25, %v92_v33 }
  0x18   :  { %v77_v18 = vadd.f32 %v76_v17, %v75_v16  ;;  %v69_v19 = vld.sshfl [vmem:[#allocation1 + $0x10] sm:$0xff pattern:$0x75316420]  ;;  %v70_v20 = vld.sshfl [vmem:[#allocation1 + $0x18] sm:$0xff pattern:$0x75316420] }
  0x19   :  { %v80_v21 = vsel %vm46_vm0, %v69_v19, 0.0  ;;  %v81_v22 = vsel %vm46_vm0, %v70_v20, 0.0 }
  0x1a   :  { %78 = vadd.xlane.f32.xlu1 %v77_v18  ;;  %55 = vadd.xlane.f32.xlu0 %v54_v15  ;;  %v82_v23 = vadd.f32 %v81_v22, %v80_v21 }
  0x22   :  { %83 = vadd.xlane.f32.xlu1 %v82_v23 }
  0x85   :  { %v51_v27 = vpop.xlane.xlu0 %50 }
  0x86   :  { %v57_v35 = vsel %vm46_vm0, %v51_v27, 0.0 }
  0x8d   :  { %v79_v31 = vpop.xlane.xlu1 %78  ;;  %v56_v32 = vpop.xlane.xlu0 %55 }
  0x8e   :  { %v58_v34 = vsel %vm46_vm0, %v56_v32, 0.0  ;;  %v85_v40 = vsel %vm46_vm0, %v79_v31, 0.0 }
  0x8f   :  { %v59_v36 = vadd.f32 %v58_v34, %v57_v35 }
  0x91   :  { %v95_v38 = vmul.f32 %v94_v37, %v59_v36 }
  0x93   :  { %v97_v43 = vmul.f32 %v95_v38, %v95_v38 }
  0x95   :  { %v84_v39 = vpop.xlane.xlu1 %83 }
  0x96   :  { %v86_v41 = vsel %vm46_vm0, %v84_v39, 0.0 }
  0x97   :  { %v87_v42 = vadd.f32 %v86_v41, %v85_v40 }
  0x99   :  { %v96_v44 = vmul.f32 %v94_v37, %v87_v42 }
  0x9b   :  { %v98_v45 = vsub.f32 %v96_v44, %v97_v43 }
  0x9d   :  { %v99_v46 = vmax.f32 %v98_v45, 0.0 }
  0x9f   :  { %v102_v47 = vadd.f32 1e-05, %v99_v46 }
  0xa1   :  { %170 = vrsqrt.f32 %v102_v47  ;;  %vm109_vm3 = vweird.f32 %v102_v47 }
  0xa7   :  { %v171_v48 = vpop.eup %170 }
  0xa8   :  { %v104_v49 = vmul.f32 %v171_v48, %v102_v47  ;;  %vm110_vm2 = vweird.f32 %v171_v48 }
  0xa9   :  { %vm111_vm4 = vmor %vm109_vm3, %vm110_vm2 }
  0xaa   :  { %v105_v50 = vmul.f32 %v171_v48, %v104_v49 }
  0xac   :  { %v106_v51 = vmul.f32 0.5, %v105_v50 }
  0xae   :  { %v107_v52 = vsub.f32 1.5, %v106_v51 }
  0xb0   :  { %v108_v54 = vmul.f32 %v171_v48, %v107_v52 }
  0xb2   :  { %v112_v55 = vsel %vm111_vm4, %v171_v48, %v108_v54 }
  0xb3   :  { %v113_v56 = vmul.f32 %v112_v55, %v100_v53 }
  0xb5   :  { %118 = vperm.xlu2 %166, %v113_v56   ;;  %v114_v57 = vmul.f32 %v113_v56, %v95_v38 }
  0xb7   :  { %v115_v59 = vsub.f32 %v101_v58, %v114_v57 }
  0xbd   :  { %129 = vperm.xlu2 %166, %v115_v59  }
 0x10f   :  { %v119_v62 = vpop.permute.xlu2 %118 }
 0x110   :  { %v123_v2 = vperm.slane %v119_v62, %v122_v63 }
 0x112   :  { %v125_v4 = vmul.f32 %v123_v2, %v257_v0  ;;  %v126_v5 = vmul.f32 %v123_v2, %v259_v1 }
 0x117   :  { %v130_v3 = vpop.permute.xlu2 %129 }
 0x118   :  { %v134_v6 = vperm.slane %v130_v3, %v122_v63 }
 0x11a   :  { %v136_v7 = vadd.f32 %v134_v6, %v125_v4  ;;  %v137_v8 = vadd.f32 %v134_v6, %v126_v5 }
 0x11c   :  { %138 = vst [vmem:[#allocation5] sm:$0xff] %v136_v7 }
 0x11d   :  { %139 = vst [vmem:[#allocation5 + $0x8] sm:$0xff] %v137_v8 }
 0x11e   :  { %152 = dma.vmem_to_hbm [thread:$0]  %s145_s22, 256, %s147_s25, [#allocation4], %s225_s17, %s225_s17, %s226_s18  }
 0x11f   :  { %222 = dma.done.wait [#allocation4], 256  }
 0x120   :  { %223 = vsyncadd [#allocation4], 4294967040 }
 0x121   :  { %157 = vsyncpa [#allocation3], 1 }
 0x122   :  { %158 = vsyncpa [#allocation4], 1 }

</bundles_post_ra>
